<compile_context>
chip_gen: v6e
topology: v6e:2x2x1
jax: 0.10.0
libtpu: 0.0.40
codegen_flags: <defaults>
</compile_context>

<pallas_src>
import functools

import numpy as np

import jax
import jax.numpy as jnp
from jax import lax
from jax.experimental import pallas as pl
from jax.experimental.pallas import tpu as pltpu


def _round_up(v, m):
    return (v + m - 1) // m * m


def _tpu_config():
    """Return (num_tensorcores, vmem_limit_bytes, input_vmem_budget_bytes)."""
    try:
        vmem_cap = int(pltpu.get_tpu_info().vmem_capacity_bytes)
    except Exception:
        vmem_cap = 64 * 1024 * 1024            # conservative (v7x per-TC)
    try:
        kind = jax.devices()[0].device_kind.lower()
    except Exception:
        kind = ""
    if any(t in kind for t in ("v5e", "v5 lite", "v5lite", "v6e", "v6 lite", "v6lite")):
        ncores = 1                              # single TensorCore chips
    elif any(t in kind for t in ("v4", "v5p", "v7", "7x")):
        ncores = 2                              # megacore / dual-TC chips
    else:
        ncores = 1                              # safe default (always correct)
    frac = 0.75 if vmem_cap >= 96 * 1024 * 1024 else 0.6
    vmem_limit = int(vmem_cap * frac)
    return ncores, vmem_limit, vmem_limit // 2


def _dc_bce_kernel(x_ref, y_ref, inter_ref, denom_ref, bce_ref, *,
                   rows, tile, acc_w, n_sub, hw_r, steps_per_core,
                   first_masked_tile, emit_unmasked, emit_masked):
    """Reduces one (rows, tile) slab into narrow (rows, acc_w) resident accumulators."""
    c = pl.program_id(0)   # core split of the lane-tile axis ("parallel")
    s = pl.program_id(1)   # reduction steps within this core ("arbitrary")

    @pl.when(s == 0)
    def _init():
        inter_ref[...] = jnp.zeros_like(inter_ref)
        denom_ref[...] = jnp.zeros_like(denom_ref)
        bce_ref[...] = jnp.zeros_like(bce_ref)

    t = c * steps_per_core + s          # global (un-clamped) lane-tile index

    def accumulate(masked):
        zero = jnp.zeros((rows, acc_w), jnp.float32)
        inter, denom, bces = zero, zero, zero
        for j in range(n_sub):          # static slices; partials stay in vregs
            xs = x_ref[:, j * acc_w:(j + 1) * acc_w].astype(jnp.float32)
            ys = y_ref[:, j * acc_w:(j + 1) * acc_w].astype(jnp.float32)
            # Shared transcendental: e = exp(-|x|) feeds both sigmoid and stable BCE.
            e = jnp.exp(-jnp.abs(xs))
            d = 1.0 + e
            r0 = pl.reciprocal(d, approx=True)          # EUP slot
            inv = r0 * (2.0 - d * r0)                   # one Newton step (~1e-7 rel)
            p = jnp.where(xs >= 0.0, inv, e * inv)      # sigmoid(x)
            bce = jnp.maximum(xs, 0.0) - xs * ys + jnp.log1p(e)
            if masked:
                lane = lax.broadcasted_iota(jnp.int32, (rows, acc_w), 1)
                valid = (t * tile + j * acc_w + lane) < hw_r
                # Masking y, p and bce is sufficient: every accumulated term
                # (p*y, p+y, bce) then sees zeros in the invalid lanes.
                ys = jnp.where(valid, ys, 0.0)
                p = jnp.where(valid, p, 0.0)
                bce = jnp.where(valid, bce, 0.0)
            inter = inter + p * ys
            denom = denom + (p + ys)
            bces = bces + bce
        inter_ref[...] += inter
        denom_ref[...] += denom
        bce_ref[...] += bces

    if emit_masked and emit_unmasked:
        @pl.when(t < first_masked_tile)
        def _steady():
            accumulate(False)

        @pl.when(t >= first_masked_tile)
        def _edge():
            accumulate(True)
    elif emit_masked:
        accumulate(True)
    else:
        accumulate(False)


def dc_and_bce_loss(net_output, target, *, weight_ce=1.0, weight_dice=1.0,
                    smooth=1e-5, max_tile=None):
    assert net_output.shape == target.shape
    B, C = int(net_output.shape[0]), int(net_output.shape[1])
    hw = int(np.prod(net_output.shape[2:]))
    bc = B * C

    ncores, vmem_limit, input_budget = _tpu_config()

    # --- sublane fill: fold a spatial factor r into the row axis (free reshape) -----
    ROW_CAP = 32
    r = 1
    if bc % 8 != 0:
        best_fill = bc / _round_up(bc, 8)
        cand = 2
        while bc * cand <= ROW_CAP:
            if hw % cand == 0:
                fill = (bc * cand) / _round_up(bc * cand, 8)
                if fill > best_fill + 1e-9:
                    best_fill, r = fill, cand
            cand += 1
    rows = bc * r
    hw_r = hw // r

    # --- accumulator width & lane tile ----------------------------------------------
    acc_w = 512 if rows <= 8 else (256 if rows <= 20 else 128)
    if hw_r <= acc_w:
        acc_w = hw_r
        tile = hw_r
    else:
        in_bytes_per_lane = rows * 2 * (net_output.dtype.itemsize + target.dtype.itemsize)
        budget_lanes = (input_budget // max(in_bytes_per_lane, 1)) // acc_w * acc_w
        cover = _round_up(hw_r, acc_w)
        tile = min(max(budget_lanes, acc_w), cover, 64 * acc_w)
        if max_tile is not None:
            tile = min(tile, max(acc_w, (int(max_tile) // acc_w) * acc_w))
        tile = max(acc_w, (tile // acc_w) * acc_w)
    n_sub = tile // acc_w

    total_tiles = -(-hw_r // tile)
    steps = -(-total_tiles // ncores)
    padded_tiles = steps * ncores
    first_masked = hw_r // tile                     # tiles >= this are ragged/duplicate
    emit_masked = padded_tiles * tile != hw_r
    emit_unmasked = first_masked > 0
    needs_clamp = padded_tiles > total_tiles

    if needs_clamp:
        last = total_tiles - 1
        in_map = lambda cc, ss: (0, jnp.minimum(cc * steps + ss, last))
    else:
        in_map = lambda cc, ss: (0, cc * steps + ss)
    out_map = lambda cc, ss: (cc, 0, 0)

    # Free contiguous reshape (no transpose): rows on sublanes, spatial on lanes.
    x2 = net_output.reshape(rows, hw_r)
    y2 = target.reshape(rows, hw_r)                 # keep native dtype (bf16/int8 ok)

    kernel = functools.partial(
        _dc_bce_kernel, rows=rows, tile=tile, acc_w=acc_w, n_sub=n_sub, hw_r=hw_r,
        steps_per_core=steps, first_masked_tile=first_masked,
        emit_unmasked=emit_unmasked, emit_masked=emit_masked)

    part = jax.ShapeDtypeStruct((ncores, rows, acc_w), jnp.float32)
    inter_p, denom_p, bce_p = pl.pallas_call(
        kernel,
        out_shape=(part, part, part),
        grid_spec=pltpu.PrefetchScalarGridSpec(
            num_scalar_prefetch=0,
            grid=(ncores, steps),
            in_specs=[pl.BlockSpec((rows, tile), in_map),
                      pl.BlockSpec((rows, tile), in_map)],
            out_specs=tuple(pl.BlockSpec((None, rows, acc_w), out_map)
                            for _ in range(3)),
        ),
        compiler_params=pltpu.CompilerParams(
            dimension_semantics=("parallel", "arbitrary"),
            vmem_limit_bytes=vmem_limit),
    )(x2, y2)

    # Tiny JAX epilogue: fold cores + batch + spatial-fold + lanes, then scalar math.
    def fold(p_):
        return p_.reshape(ncores, B, C, r, acc_w).sum(axis=(0, 1, 3, 4))

    intersect = fold(inter_p)
    denom = fold(denom_p)                           # = sum_pred + sum_gt
    dc = (2.0 * intersect + smooth) / jnp.maximum(denom + smooth, 1e-8)
    dc_loss = -jnp.mean(dc)                         # batch_dice=True, do_bg=True
    ce_loss = jnp.sum(bce_p) / float(B * C * hw)    # BCEWithLogits reduction='mean'
    return weight_ce * ce_loss + weight_dice * dc_loss


def _reference(net_output, target, weight_ce=1.0, weight_dice=1.0, smooth=1e-5):
    """Pure-JAX reference matching the PyTorch module semantics."""
    x = net_output.astype(jnp.float32)
    y = target.astype(jnp.float32)
    p = jax.nn.sigmoid(x)
    axes = (0,) + tuple(range(2, x.ndim))     # batch_dice=True: reduce batch + spatial
    intersect = jnp.sum(p * y, axis=axes)
    sum_pred = jnp.sum(p, axis=axes)
    sum_gt = jnp.sum(y, axis=axes)
    dc = (2.0 * intersect + smooth) / jnp.maximum(sum_gt + sum_pred + smooth, 1e-8)
    dc_loss = -jnp.mean(dc)
    bce = jnp.maximum(x, 0.0) - x * y + jnp.log1p(jnp.exp(-jnp.abs(x)))
    ce_loss = jnp.mean(bce)
    return weight_ce * ce_loss + weight_dice * dc_loss


if __name__ == "__main__":
    key = jax.random.PRNGKey(0)
    k1, k2, k3, k4, k5, k6 = jax.random.split(key, 6)

    # Case 1: B*C = 8 sublane rows, small spatial extent -> single covering lane block.
    x1 = jax.random.normal(k1, (2, 4, 16, 16), dtype=jnp.float32)             # logits
    y1 = (jax.random.uniform(k2, (2, 4, 16, 16)) > 0.5).astype(jnp.bfloat16)  # regions
    got1 = jax.block_until_ready(jax.jit(dc_and_bce_loss)(x1, y1))
    np.testing.assert_allclose(np.asarray(got1), np.asarray(_reference(x1, y1)),
                               rtol=1e-5, atol=1e-5)

    # Case 2: B*C = 3 (sublane-fill fold kicks in), ragged spatial extent 130.
    x2 = jax.random.normal(k3, (1, 3, 10, 13), dtype=jnp.float32)
    y2 = (jax.random.uniform(k4, (1, 3, 10, 13)) > 0.5).astype(jnp.bfloat16)
    got2 = jax.block_until_ready(jax.jit(dc_and_bce_loss)(x2, y2))
    np.testing.assert_allclose(np.asarray(got2), np.asarray(_reference(x2, y2)),
                               rtol=1e-5, atol=1e-5)

    # Case 3: forced small tile -> multi-step reduction with a ragged tail; exercises
    # the unmasked steady-state branch, the masked edge branch, and accumulation.
    x3 = jax.random.normal(k5, (2, 4, 40, 52), dtype=jnp.float32)
    y3 = (jax.random.uniform(k6, (2, 4, 40, 52)) > 0.5).astype(jnp.bfloat16)
    got3 = jax.block_until_ready(
        jax.jit(functools.partial(dc_and_bce_loss, max_tile=512))(x3, y3))
    np.testing.assert_allclose(np.asarray(got3), np.asarray(_reference(x3, y3)),
                               rtol=1e-5, atol=1e-5)

    # Case 4: same data with default tiling (single covering tile, sub-slice loop).
    got4 = jax.block_until_ready(jax.jit(dc_and_bce_loss)(x3, y3))
    np.testing.assert_allclose(np.asarray(got4), np.asarray(_reference(x3, y3)),
                               rtol=1e-5, atol=1e-5)

    print("KERNEL_OK")
</pallas_src>

<mosaic_0001>
module attributes {stable_mosaic.version = 11 : i64} {
  func.func @_dc_bce_kernel(%arg0: i32, %arg1: i32, %arg2: memref<8x256xf32, #tpu.memory_space<vmem>>, %arg3: memref<8x256xbf16, #tpu.memory_space<vmem>>, %arg4: memref<1x8x256xf32, #tpu.memory_space<vmem>>, %arg5: memref<1x8x256xf32, #tpu.memory_space<vmem>>, %arg6: memref<1x8x256xf32, #tpu.memory_space<vmem>>) attributes {dimension_semantics = [#tpu.dimension_semantics<parallel>, #tpu.dimension_semantics<arbitrary>], iteration_bounds = array<i64: 1, 1>, scalar_prefetch = 0 : i64, scratch_operands = 0 : i64, tpu.core_type = #tpu.core_type<tc>, window_params = [{transform_indices = @transform_0, window_bounds = array<i64: 8, 256>}, {transform_indices = @transform_1, window_bounds = array<i64: 8, 256>}, {transform_indices = @transform_2, window_bounds = array<i64: 1, 8, 256>}, {transform_indices = @transform_3, window_bounds = array<i64: 1, 8, 256>}, {transform_indices = @transform_4, window_bounds = array<i64: 1, 8, 256>}]} {
    %c0_i32 = arith.constant 0 : i32
    %0 = arith.cmpi eq, %arg1, %c0_i32 : i32
    %1 = arith.extui %0 : i1 to i32
    %c0_i32_0 = arith.constant 0 : i32
    %2 = arith.cmpi ne, %1, %c0_i32_0 : i32
    scf.if %2 {
      %cst_27 = arith.constant 0.000000e+00 : f32
      %51 = vector.broadcast %cst_27 : f32 to vector<8x256xf32>
      %c0_28 = arith.constant 0 : index
      %c0_29 = arith.constant 0 : index
      %c0_30 = arith.constant 0 : index
      %52 = vector.load %arg4[%c0_28, %c0_29, %c0_30] : memref<1x8x256xf32, #tpu.memory_space<vmem>>, vector<1x8x256xf32>
      %53 = vector.shape_cast %52 : vector<1x8x256xf32> to vector<8x256xf32>
      %54 = vector.shape_cast %51 : vector<8x256xf32> to vector<1x8x256xf32>
      tpu.vector_store %arg4[%c0_28, %c0_29, %c0_30], %54 {strides = array<i32>} : memref<1x8x256xf32, #tpu.memory_space<vmem>>, vector<1x8x256xf32>,
      %cst_31 = arith.constant 0.000000e+00 : f32
      %55 = vector.broadcast %cst_31 : f32 to vector<8x256xf32>
      %c0_32 = arith.constant 0 : index
      %c0_33 = arith.constant 0 : index
      %c0_34 = arith.constant 0 : index
      %56 = vector.load %arg5[%c0_32, %c0_33, %c0_34] : memref<1x8x256xf32, #tpu.memory_space<vmem>>, vector<1x8x256xf32>
      %57 = vector.shape_cast %56 : vector<1x8x256xf32> to vector<8x256xf32>
      %58 = vector.shape_cast %55 : vector<8x256xf32> to vector<1x8x256xf32>
      tpu.vector_store %arg5[%c0_32, %c0_33, %c0_34], %58 {strides = array<i32>} : memref<1x8x256xf32, #tpu.memory_space<vmem>>, vector<1x8x256xf32>,
      %cst_35 = arith.constant 0.000000e+00 : f32
      %59 = vector.broadcast %cst_35 : f32 to vector<8x256xf32>
      %c0_36 = arith.constant 0 : index
      %c0_37 = arith.constant 0 : index
      %c0_38 = arith.constant 0 : index
      %60 = vector.load %arg6[%c0_36, %c0_37, %c0_38] : memref<1x8x256xf32, #tpu.memory_space<vmem>>, vector<1x8x256xf32>
      %61 = vector.shape_cast %60 : vector<1x8x256xf32> to vector<8x256xf32>
      %62 = vector.shape_cast %59 : vector<8x256xf32> to vector<1x8x256xf32>
      tpu.vector_store %arg6[%c0_36, %c0_37, %c0_38], %62 {strides = array<i32>} : memref<1x8x256xf32, #tpu.memory_space<vmem>>, vector<1x8x256xf32>,
    } else {
    }
    %cst = arith.constant 0.000000e+00 : f32
    %3 = vector.broadcast %cst : f32 to vector<8x256xf32>
    %c0 = arith.constant 0 : index
    %c0_1 = arith.constant 0 : index
    %4 = vector.load %arg2[%c0, %c0_1] : memref<8x256xf32, #tpu.memory_space<vmem>>, vector<8x256xf32>
    %c0_2 = arith.constant 0 : index
    %c0_3 = arith.constant 0 : index
    %5 = vector.load %arg3[%c0_2, %c0_3] : memref<8x256xbf16, #tpu.memory_space<vmem>>, vector<8x256xbf16>
    %6 = arith.extf %5 : vector<8x256xbf16> to vector<8x256xf32>
    %7 = math.absf %4 : vector<8x256xf32>
    %cst_4 = arith.constant 0.000000e+00 : f32
    %8 = vector.broadcast %cst_4 : f32 to vector<8x256xf32>
    %9 = arith.subf %8, %7 : vector<8x256xf32>
    %10 = math.exp %9 : vector<8x256xf32>
    %cst_5 = arith.constant 1.000000e+00 : f32
    %11 = vector.broadcast %cst_5 : f32 to vector<8x256xf32>
    %12 = arith.addf %11, %10 : vector<8x256xf32>
    %13 = tpu.reciprocal %12 {approx = true} : vector<8x256xf32> -> vector<8x256xf32>
    %14 = arith.mulf %12, %13 : vector<8x256xf32>
    %cst_6 = arith.constant 2.000000e+00 : f32
    %15 = vector.broadcast %cst_6 : f32 to vector<8x256xf32>
    %16 = arith.subf %15, %14 : vector<8x256xf32>
    %17 = arith.mulf %13, %16 : vector<8x256xf32>
    %cst_7 = arith.constant 0.000000e+00 : f32
    %18 = vector.broadcast %cst_7 : f32 to vector<8x256xf32>
    %19 = arith.cmpf oge, %4, %18 : vector<8x256xf32>
    %20 = arith.mulf %10, %17 : vector<8x256xf32>
    %21 = arith.select %19, %17, %20 : vector<8x256xi1>, vector<8x256xf32>
    %cst_8 = arith.constant 0.000000e+00 : f32
    %22 = vector.broadcast %cst_8 : f32 to vector<8x256xf32>
    %23 = arith.maximumf %4, %22 : vector<8x256xf32>
    %24 = arith.mulf %4, %6 : vector<8x256xf32>
    %25 = arith.subf %23, %24 : vector<8x256xf32>
    %26 = math.log1p %10 : vector<8x256xf32>
    %27 = arith.addf %25, %26 : vector<8x256xf32>
    %28 = arith.mulf %21, %6 : vector<8x256xf32>
    %29 = arith.addf %3, %28 : vector<8x256xf32>
    %30 = arith.addf %21, %6 : vector<8x256xf32>
    %31 = arith.addf %3, %30 : vector<8x256xf32>
    %32 = arith.addf %3, %27 : vector<8x256xf32>
    %c0_9 = arith.constant 0 : index
    %c0_10 = arith.constant 0 : index
    %c0_11 = arith.constant 0 : index
    %33 = vector.load %arg4[%c0_9, %c0_10, %c0_11] : memref<1x8x256xf32, #tpu.memory_space<vmem>>, vector<1x8x256xf32>
    %34 = vector.shape_cast %33 : vector<1x8x256xf32> to vector<8x256xf32>
    %35 = arith.addf %34, %29 : vector<8x256xf32>
    %c0_12 = arith.constant 0 : index
    %c0_13 = arith.constant 0 : index
    %c0_14 = arith.constant 0 : index
    %36 = vector.load %arg4[%c0_12, %c0_13, %c0_14] : memref<1x8x256xf32, #tpu.memory_space<vmem>>, vector<1x8x256xf32>
    %37 = vector.shape_cast %36 : vector<1x8x256xf32> to vector<8x256xf32>
    %38 = vector.shape_cast %35 : vector<8x256xf32> to vector<1x8x256xf32>
    tpu.vector_store %arg4[%c0_12, %c0_13, %c0_14], %38 {strides = array<i32>} : memref<1x8x256xf32, #tpu.memory_space<vmem>>, vector<1x8x256xf32>,
    %c0_15 = arith.constant 0 : index
    %c0_16 = arith.constant 0 : index
    %c0_17 = arith.constant 0 : index
    %39 = vector.load %arg5[%c0_15, %c0_16, %c0_17] : memref<1x8x256xf32, #tpu.memory_space<vmem>>, vector<1x8x256xf32>
    %40 = vector.shape_cast %39 : vector<1x8x256xf32> to vector<8x256xf32>
    %41 = arith.addf %40, %31 : vector<8x256xf32>
    %c0_18 = arith.constant 0 : index
    %c0_19 = arith.constant 0 : index
    %c0_20 = arith.constant 0 : index
    %42 = vector.load %arg5[%c0_18, %c0_19, %c0_20] : memref<1x8x256xf32, #tpu.memory_space<vmem>>, vector<1x8x256xf32>
    %43 = vector.shape_cast %42 : vector<1x8x256xf32> to vector<8x256xf32>
    %44 = vector.shape_cast %41 : vector<8x256xf32> to vector<1x8x256xf32>
    tpu.vector_store %arg5[%c0_18, %c0_19, %c0_20], %44 {strides = array<i32>} : memref<1x8x256xf32, #tpu.memory_space<vmem>>, vector<1x8x256xf32>,
    %c0_21 = arith.constant 0 : index
    %c0_22 = arith.constant 0 : index
    %c0_23 = arith.constant 0 : index
    %45 = vector.load %arg6[%c0_21, %c0_22, %c0_23] : memref<1x8x256xf32, #tpu.memory_space<vmem>>, vector<1x8x256xf32>
    %46 = vector.shape_cast %45 : vector<1x8x256xf32> to vector<8x256xf32>
    %47 = arith.addf %46, %32 : vector<8x256xf32>
    %c0_24 = arith.constant 0 : index
    %c0_25 = arith.constant 0 : index
    %c0_26 = arith.constant 0 : index
    %48 = vector.load %arg6[%c0_24, %c0_25, %c0_26] : memref<1x8x256xf32, #tpu.memory_space<vmem>>, vector<1x8x256xf32>
    %49 = vector.shape_cast %48 : vector<1x8x256xf32> to vector<8x256xf32>
    %50 = vector.shape_cast %47 : vector<8x256xf32> to vector<1x8x256xf32>
    tpu.vector_store %arg6[%c0_24, %c0_25, %c0_26], %50 {strides = array<i32>} : memref<1x8x256xf32, #tpu.memory_space<vmem>>, vector<1x8x256xf32>,
    return
  }
  func.func @transform_0(%arg0: i32, %arg1: i32) -> (i32, i32) {
    %c1_i32 = arith.constant 1 : i32
    %0 = arith.muli %arg0, %c1_i32 : i32
    %1 = arith.addi %0, %arg1 : i32
    %c0_i32 = arith.constant 0 : i32
    %c0_i32_0 = arith.constant 0 : i32
    return %c0_i32, %1 : i32, i32
  }
  func.func @transform_1(%arg0: i32, %arg1: i32) -> (i32, i32) {
    %c1_i32 = arith.constant 1 : i32
    %0 = arith.muli %arg0, %c1_i32 : i32
    %1 = arith.addi %0, %arg1 : i32
    %c0_i32 = arith.constant 0 : i32
    %c0_i32_0 = arith.constant 0 : i32
    return %c0_i32, %1 : i32, i32
  }
  func.func @transform_2(%arg0: i32, %arg1: i32) -> (i32, i32, i32) {
    %c0_i32 = arith.constant 0 : i32
    %c0_i32_0 = arith.constant 0 : i32
    %c0_i32_1 = arith.constant 0 : i32
    return %arg0, %c0_i32, %c0_i32_0 : i32, i32, i32
  }
  func.func @transform_3(%arg0: i32, %arg1: i32) -> (i32, i32, i32) {
    %c0_i32 = arith.constant 0 : i32
    %c0_i32_0 = arith.constant 0 : i32
    %c0_i32_1 = arith.constant 0 : i32
    return %arg0, %c0_i32, %c0_i32_0 : i32, i32, i32
  }
  func.func @transform_4(%arg0: i32, %arg1: i32) -> (i32, i32, i32) {
    %c0_i32 = arith.constant 0 : i32
    %c0_i32_0 = arith.constant 0 : i32
    %c0_i32_1 = arith.constant 0 : i32
    return %arg0, %c0_i32, %c0_i32_0 : i32, i32, i32
  }
}

</mosaic_0001>

<bundles_post_ra>
// kernel: dc_and_bce_loss.1
= control target key start
LH: loop header
LB: loop body
LE: loop exit
PB: predicated region body
PF: predicated region fallthrough
CT: control target
= control target key end

     0   :  { %s240_s0 = inlined_call_operand.vmem [shape: f32[8,256], index: 0, kind: input, shape index: {}]   ;;  %s241_s1 = inlined_call_operand.vmem [shape: bf16[8,256], index: 1, kind: input, shape index: {}]   ;;  %s242_s4 = inlined_call_operand.vmem [shape: f32[1,8,256], index: 4, kind: output, shape index: {2}]   ;;  %s243_s2 = inlined_call_operand.vmem [shape: f32[1,8,256], index: 2, kind: output, shape index: {0}]   ;;  %s244_s3 = inlined_call_operand.vmem [shape: f32[1,8,256], index: 3, kind: output, shape index: {1}]  }
   0x1   :  { %v68_v0 = vld [vmem:[%s240_s0] sm:$0xff]  ;;  %v69_v1 = vld [vmem:[%s240_s0 + $0x8] sm:$0xff] }
   0x2   :  { %v73_v2 = vand.u32 2147483647, %v68_v0  ;;  %v74_v3 = vand.u32 2147483647, %v69_v1  ;;  %v70_v12 = vld [vmem:[%s241_s1] sm:$0xff]  ;;  %v97_v18 = vmax.f32 %v68_v0, 0.0 }
   0x3   :  { %v71_v14 = vunpack.c.l.bf16 %v70_v12  ;;  %v72_v16 = vunpack.c.h.bf16 %v70_v12  ;;  %v98_v22 = vmax.f32 %v69_v1, 0.0  ;;  %vm91_vm2 = vcmp.ge.f32.partialorder %v68_v0, 0.0 }
   0x4   :  { %v75_v4 = vsub.f32 0.0, %v73_v2  ;;  %v76_v5 = vsub.f32 0.0, %v74_v3  ;;  %vm92_vm3 = vcmp.ge.f32.partialorder %v69_v1, 0.0 }
   0x5   :  { %v99_v19 = vmul.f32 %v71_v14, %v68_v0  ;;  %v100_v23 = vmul.f32 %v72_v16, %v69_v1 }
   0x6   :  { %v77_v6 = vmul.f32 1.442695, %v75_v4  ;;  %v79_v7 = vmul.f32 1.442695, %v76_v5 }
   0x7   :  { %v101_v31 = vsub.f32 %v97_v18, %v99_v19  ;;  %v102_v36 = vsub.f32 %v98_v22, %v100_v23 }
   0x8   :  { %176 = vpow2.f32 %v77_v6 }
   0x9   :  { %178 = vpow2.f32 %v79_v7 }
  0x15   :  { %v177_v8 = vpop.eup %176 }
  0x16   :  { %v179_v9 = vpop.eup %178  ;;  %v81_v10 = vadd.f32 1.0, %v177_v8  ;;  %v106_v13 = vmul.f32 -0.5, %v177_v8  ;;  %v109_v20 = vand.u32 2147483647, %v177_v8 }
  0x17   :  { %v82_v11 = vadd.f32 1.0, %v179_v9  ;;  %v115_v15 = vmul.f32 -0.5, %v179_v9  ;;  %v118_v24 = vand.u32 2147483647, %v179_v9 }
  0x18   :  { %180 = vrcp.f32 %v81_v10  ;;  %v107_v17 = vadd.f32 1.0, %v106_v13  ;;  %vm110_vm0 = vcmp.lt.f32.partialorder %v109_v20, 0.0004427343 }
  0x19   :  { %182 = vrcp.f32 %v82_v11  ;;  %v116_v21 = vadd.f32 1.0, %v115_v15  ;;  %vm119_vm1 = vcmp.lt.f32.partialorder %v118_v24, 0.0004427343 }
  0x1a   :  { %184 = vlog2.f32 %v81_v10  ;;  %v108_v28 = vmul.f32 %v177_v8, %v107_v17 }
  0x1b   :  { %186 = vlog2.f32 %v82_v11  ;;  %v117_v32 = vmul.f32 %v179_v9, %v116_v21 }
  0x25   :  { %v181_v25 = vpop.eup %180 }
  0x26   :  { %v183_v26 = vpop.eup %182  ;;  %v85_v27 = vmul.f32 %v181_v25, %v81_v10 }
  0x27   :  { %v185_v29 = vpop.eup %184  ;;  %v86_v30 = vmul.f32 %v183_v26, %v82_v11 }
  0x28   :  { %v187_v33 = vpop.eup %186  ;;  %v87_v34 = vsub.f32 2.0, %v85_v27  ;;  %v105_v35 = vmul.f32 0.6931472, %v185_v29 }
  0x29   :  { %v88_v37 = vsub.f32 2.0, %v86_v30  ;;  %v114_v38 = vmul.f32 0.6931472, %v187_v33 }
  0x2a   :  { %v89_v39 = vmul.f32 %v181_v25, %v87_v34  ;;  %v111_v40 = vsel %vm110_vm0, %v108_v28, %v105_v35 }
  0x2b   :  { %v90_v41 = vmul.f32 %v183_v26, %v88_v37  ;;  %v121_v42 = vadd.f32 %v111_v40, %v101_v31  ;;  %v120_v43 = vsel %vm119_vm1, %v117_v32, %v114_v38 }
  0x2c   :  { %v93_v44 = vmul.f32 %v177_v8, %v89_v39  ;;  %v122_v45 = vadd.f32 %v120_v43, %v102_v36 }
  0x2d   :  { %v94_v46 = vmul.f32 %v179_v9, %v90_v41  ;;  %149 = vst [vmem:[%s242_s4] sm:$0xff] %v121_v42 }
  0x2e   :  { %v95_v47 = vsel %vm91_vm2, %v89_v39, %v93_v44  ;;  %150 = vst [vmem:[%s242_s4 + $0x8] sm:$0xff] %v122_v45 }
  0x2f   :  { %v123_v48 = vmul.f32 %v95_v47, %v71_v14  ;;  %v96_v49 = vsel %vm92_vm3, %v90_v41, %v94_v46  ;;  %v127_v50 = vadd.f32 %v95_v47, %v71_v14 }
  0x30   :  { %v124_v51 = vmul.f32 %v96_v49, %v72_v16  ;;  %v128_v52 = vadd.f32 %v96_v49, %v72_v16 }
  0x31   :  { %137 = vst [vmem:[%s243_s2] sm:$0xff] %v123_v48  ;;  %143 = vst [vmem:[%s244_s3] sm:$0xff] %v127_v50 }
  0x32   :  { %138 = vst [vmem:[%s243_s2 + $0x8] sm:$0xff] %v124_v51  ;;  %144 = vst [vmem:[%s244_s3 + $0x8] sm:$0xff] %v128_v52 }

</bundles_post_ra>
